<compile_context>
chip_gen: v7x
topology: tpu7x:2x2x1
jax: 0.10.0
libtpu: 0.0.40
codegen_flags: <defaults>
</compile_context>

<pallas_src>
import functools

import jax
import jax.numpy as jnp
from jax.experimental import pallas as pl
from jax.experimental.pallas import tpu as pltpu


def _round_up(v, m):
    return (v + m - 1) // m * m


def _resblock_kernel(x_ref, s1_ref, b1_ref, w1_ref, s2_ref, b2_ref, w2_ref,
                     o_ref, *, L_real, L_pad, dilation, matmul_dtype):
    M, _ = x_ref.shape                               # M = B_TILE * L_pad
    x = x_ref[...]                                   # (M, C_pad) f32

    # Position of every row inside its own sample.  Each grid block starts on a
    # sample boundary (M is a multiple of L_pad), so row r sits at position
    # r % L_pad of some sample.
    row = jax.lax.broadcasted_iota(jnp.int32, (M, 1), 0)
    l_pos = jax.lax.rem(row, L_pad)
    valid = l_pos < L_real                           # rows past the true length

    def conv3(act, w_ref, d):
        # act: (M, Cin) f32, already zero on rows >= L_real.
        # w_ref: (3*Cin, Cout) in matmul dtype, taps stacked along K.
        # Shifted tap operands via XLU sublane rotation; the masks implement the
        # conv zero-padding AND kill cross-sample / wrap-around leakage.
        t_prev = jnp.where(l_pos >= d,
                           pltpu.roll(act, shift=d, axis=0), 0.0)
        t_next = jnp.where(l_pos < L_pad - d,
                           pltpu.roll(act, shift=M - d, axis=0), 0.0)
        im2col = jnp.concatenate([t_prev, act, t_next], axis=1)   # (M, 3*Cin)
        return jnp.dot(im2col.astype(matmul_dtype), w_ref[...],
                       preferred_element_type=jnp.float32)

    # ---- BN1 (folded, eval mode) + ReLU; zero beyond true sequence length ----
    a = jnp.where(valid, jnp.maximum(x * s1_ref[...] + b1_ref[...], 0.0), 0.0)
    # ---- conv1: kernel_size=3, dilation=d, padding=d (one fused matmul) ------
    y1 = conv3(a, w1_ref, dilation)

    # ---- BN2 + ReLU -----------------------------------------------------------
    b = jnp.where(valid, jnp.maximum(y1 * s2_ref[...] + b2_ref[...], 0.0), 0.0)
    # ---- conv2: kernel_size=3, dilation=1, padding=1 --------------------------
    y2 = conv3(b, w2_ref, 1)

    # ---- identity skip ---------------------------------------------------------
    o_ref[...] = (y2 + x).astype(o_ref.dtype)


def residual_block_forward(x_ncl, params, dilation, eps=1e-5,
                           matmul_dtype=jnp.bfloat16):
    """x_ncl: (N, C, L) float32 (PyTorch Conv1d layout). Returns (N, C, L)."""
    N, C_in, L = x_ncl.shape
    C_out = params["conv1_w"].shape[0]
    assert C_out == C_in, "identity skip requires in_channels == out_channels"
    dilation = int(dilation)

    LANES, SUBLANES = 128, 8
    C_pad = _round_up(C_in, LANES)
    Co_pad = _round_up(C_out, LANES)
    L_pad = _round_up(L, SUBLANES)

    # Fold several samples into one grid step so the MXU M dim is large, while
    # keeping the f32 row-slab vreg/VMEM friendly (~256 rows per step).
    TARGET_ROWS = 256
    B_TILE = max(1, min(N, TARGET_ROWS // L_pad))
    N_pad = _round_up(N, B_TILE)
    M_TILE = B_TILE * L_pad
    grid = (N_pad // B_TILE,)

    # Channels-last, lane-dense padding, flatten (batch, length) into rows.
    x = jnp.transpose(x_ncl, (0, 2, 1)).astype(jnp.float32)        # (N, L, C)
    x = jnp.pad(x, ((0, N_pad - N), (0, L_pad - L), (0, C_pad - C_in)))
    x2d = x.reshape(N_pad * L_pad, C_pad)

    # Fold BN (eval mode) into per-channel scale/shift; keep f32 for the VPU.
    s1 = params["bn1_gamma"] / jnp.sqrt(params["bn1_var"] + eps)
    b1 = params["bn1_beta"] - params["bn1_mean"] * s1
    s2 = params["bn2_gamma"] / jnp.sqrt(params["bn2_var"] + eps)
    b2 = params["bn2_beta"] - params["bn2_mean"] * s2
    pad1 = lambda v: jnp.pad(v.astype(jnp.float32), (0, C_pad - C_in))[None, :]
    pad2 = lambda v: jnp.pad(v.astype(jnp.float32), (0, Co_pad - C_out))[None, :]
    s1, b1, s2, b2 = pad1(s1), pad1(b1), pad2(s2), pad2(b2)

    # PyTorch Conv1d weight (Cout, Cin, K=3) -> taps stacked along K so each
    # conv is a single (M, 3*Cin) @ (3*Cin, Cout) matmul.
    def prep_w(w, cin_p, cout_p):
        k = w.shape[2]
        w = jnp.transpose(w, (2, 1, 0)).astype(jnp.float32)        # (3, Cin, Cout)
        w = jnp.pad(w, ((0, 0), (0, cin_p - w.shape[1]), (0, cout_p - w.shape[2])))
        return w.reshape(k * cin_p, cout_p).astype(matmul_dtype)

    w1 = prep_w(params["conv1_w"], C_pad, Co_pad)
    w2 = prep_w(params["conv2_w"], Co_pad, Co_pad)

    kernel = functools.partial(_resblock_kernel, L_real=L, L_pad=L_pad,
                               dilation=dilation, matmul_dtype=matmul_dtype)

    rows = N_pad * L_pad
    wbytes = jnp.dtype(matmul_dtype).itemsize
    cost = pl.CostEstimate(
        flops=2 * rows * 3 * (C_pad * Co_pad + Co_pad * Co_pad),
        transcendentals=0,
        bytes_accessed=rows * (C_pad + Co_pad) * 4 + (w1.size + w2.size) * wbytes)

    out2d = pl.pallas_call(
        kernel,
        out_shape=jax.ShapeDtypeStruct((rows, Co_pad), jnp.float32),
        grid_spec=pltpu.PrefetchScalarGridSpec(
            num_scalar_prefetch=0,
            grid=grid,
            in_specs=[
                pl.BlockSpec((M_TILE, C_pad), lambda i: (i, 0)),       # x rows
                pl.BlockSpec((1, C_pad), lambda i: (0, 0)),            # bn1 scale
                pl.BlockSpec((1, C_pad), lambda i: (0, 0)),            # bn1 shift
                pl.BlockSpec((3 * C_pad, Co_pad), lambda i: (0, 0)),   # conv1 w
                pl.BlockSpec((1, Co_pad), lambda i: (0, 0)),           # bn2 scale
                pl.BlockSpec((1, Co_pad), lambda i: (0, 0)),           # bn2 shift
                pl.BlockSpec((3 * Co_pad, Co_pad), lambda i: (0, 0)),  # conv2 w
            ],
            out_specs=pl.BlockSpec((M_TILE, Co_pad), lambda i: (i, 0)),
        ),
        compiler_params=pltpu.CompilerParams(
            dimension_semantics=("parallel",),
            vmem_limit_bytes=32 * 1024 * 1024),
        cost_estimate=cost,
    )(x2d, s1, b1, w1, s2, b2, w2)

    out = out2d.reshape(N_pad, L_pad, Co_pad)[:N, :L, :C_out]
    return jnp.transpose(out, (0, 2, 1))                              # back to NCL


def _reference(x, params, dilation, eps=1e-5):
    """Pure-JAX reference mirroring the PyTorch forward (eval-mode BN)."""
    def bn(h, g, bta, m, v):
        return (h - m[None, :, None]) / jnp.sqrt(v[None, :, None] + eps) \
            * g[None, :, None] + bta[None, :, None]

    def conv1d(h, w, dil, pad):
        return jax.lax.conv_general_dilated(
            h, w, window_strides=(1,), padding=[(pad, pad)],
            rhs_dilation=(dil,), dimension_numbers=("NCH", "OIH", "NCH"))

    a = jax.nn.relu(bn(x, params["bn1_gamma"], params["bn1_beta"],
                       params["bn1_mean"], params["bn1_var"]))
    x1 = conv1d(a, params["conv1_w"], dilation, dilation)
    b = jax.nn.relu(bn(x1, params["bn2_gamma"], params["bn2_beta"],
                       params["bn2_mean"], params["bn2_var"]))
    x2 = conv1d(b, params["conv2_w"], 1, 1)
    return x2 + x


if __name__ == "__main__":
    N, C_IN, C_OUT, L, DILATION = 2, 8, 8, 16, 2

    key = jax.random.PRNGKey(0)
    k = jax.random.split(key, 12)

    params = {
        "bn1_gamma": jax.random.uniform(k[0], (C_IN,), jnp.float32, 0.5, 1.5),
        "bn1_beta":  0.1 * jax.random.normal(k[1], (C_IN,), jnp.float32),
        "bn1_mean":  0.1 * jax.random.normal(k[2], (C_IN,), jnp.float32),
        "bn1_var":   jax.random.uniform(k[3], (C_IN,), jnp.float32, 0.5, 1.5),
        "conv1_w":   0.1 * jax.random.normal(k[4], (C_OUT, C_IN, 3), jnp.float32),
        "bn2_gamma": jax.random.uniform(k[5], (C_OUT,), jnp.float32, 0.5, 1.5),
        "bn2_beta":  0.1 * jax.random.normal(k[6], (C_OUT,), jnp.float32),
        "bn2_mean":  0.1 * jax.random.normal(k[7], (C_OUT,), jnp.float32),
        "bn2_var":   jax.random.uniform(k[8], (C_OUT,), jnp.float32, 0.5, 1.5),
        "conv2_w":   0.1 * jax.random.normal(k[9], (C_OUT, C_OUT, 3), jnp.float32),
    }

    x = jax.random.normal(k[10], (N, C_IN, L), jnp.float32)   # PyTorch NCL layout

    ref = jax.block_until_ready(_reference(x, params, DILATION))

    # f32-matmul path: tight numerical check against the pure-JAX reference.
    out_f32 = jax.block_until_ready(
        residual_block_forward(x, params, DILATION, matmul_dtype=jnp.float32))
    assert out_f32.shape == (N, C_OUT, L)
    assert jnp.allclose(out_f32, ref, atol=1e-4, rtol=1e-4), "f32 mismatch vs. JAX reference"

    # bf16-matmul path (default; MXU-rate dtype on v6e/v7x): looser tolerance,
    # f32 accumulation bounds the error.
    out_bf16 = jax.block_until_ready(residual_block_forward(x, params, DILATION))
    assert out_bf16.shape == (N, C_OUT, L)
    assert jnp.allclose(out_bf16, ref, atol=3e-2, rtol=3e-2), "bf16 mismatch vs. JAX reference"

    print("KERNEL_OK")
</pallas_src>

<mosaic_0001>
module attributes {stable_mosaic.version = 11 : i64} {
  func.func @_resblock_kernel(%arg0: i32, %arg1: memref<32x128xf32, #tpu.memory_space<vmem>>, %arg2: memref<1x128xf32, #tpu.memory_space<vmem>>, %arg3: memref<1x128xf32, #tpu.memory_space<vmem>>, %arg4: memref<384x128xf32, #tpu.memory_space<vmem>>, %arg5: memref<1x128xf32, #tpu.memory_space<vmem>>, %arg6: memref<1x128xf32, #tpu.memory_space<vmem>>, %arg7: memref<384x128xf32, #tpu.memory_space<vmem>>, %arg8: memref<32x128xf32, #tpu.memory_space<vmem>>) attributes {dimension_semantics = [#tpu.dimension_semantics<parallel>], iteration_bounds = array<i64: 1>, scalar_prefetch = 0 : i64, scratch_operands = 0 : i64, tpu.core_type = #tpu.core_type<tc>, window_params = [{transform_indices = @transform_0, window_bounds = array<i64: 32, 128>}, {pipeline_mode = #tpu.pipeline_mode<synchronous>, transform_indices = @transform_1, window_bounds = array<i64: 1, 128>}, {pipeline_mode = #tpu.pipeline_mode<synchronous>, transform_indices = @transform_2, window_bounds = array<i64: 1, 128>}, {pipeline_mode = #tpu.pipeline_mode<synchronous>, transform_indices = @transform_3, window_bounds = array<i64: 384, 128>}, {pipeline_mode = #tpu.pipeline_mode<synchronous>, transform_indices = @transform_4, window_bounds = array<i64: 1, 128>}, {pipeline_mode = #tpu.pipeline_mode<synchronous>, transform_indices = @transform_5, window_bounds = array<i64: 1, 128>}, {pipeline_mode = #tpu.pipeline_mode<synchronous>, transform_indices = @transform_6, window_bounds = array<i64: 384, 128>}, {transform_indices = @transform_7, window_bounds = array<i64: 32, 128>}]} {
    %c0 = arith.constant 0 : index
    %c0_0 = arith.constant 0 : index
    %0 = vector.load %arg1[%c0, %c0_0] : memref<32x128xf32, #tpu.memory_space<vmem>>, vector<32x128xf32>
    %1 = tpu.iota {dimensions = array<i32: 0>} : vector<32x1xi32>
    %c16_i32 = arith.constant 16 : i32
    %2 = vector.broadcast %c16_i32 : i32 to vector<32x1xi32>
    %3 = arith.remsi %1, %2 : vector<32x1xi32>
    %c16_i32_1 = arith.constant 16 : i32
    %4 = vector.broadcast %c16_i32_1 : i32 to vector<32x1xi32>
    %5 = arith.cmpi slt, %3, %4 : vector<32x1xi32>
    %c0_2 = arith.constant 0 : index
    %c0_3 = arith.constant 0 : index
    %6 = vector.load %arg2[%c0_2, %c0_3] : memref<1x128xf32, #tpu.memory_space<vmem>>, vector<1x128xf32>
    %7 = vector.broadcast %6 : vector<1x128xf32> to vector<32x128xf32>
    %8 = arith.mulf %0, %7 : vector<32x128xf32>
    %c0_4 = arith.constant 0 : index
    %c0_5 = arith.constant 0 : index
    %9 = vector.load %arg3[%c0_4, %c0_5] : memref<1x128xf32, #tpu.memory_space<vmem>>, vector<1x128xf32>
    %10 = vector.broadcast %9 : vector<1x128xf32> to vector<32x128xf32>
    %11 = arith.addf %8, %10 : vector<32x128xf32>
    %cst = arith.constant 0.000000e+00 : f32
    %12 = vector.broadcast %cst : f32 to vector<32x128xf32>
    %13 = arith.maximumf %11, %12 : vector<32x128xf32>
    %cst_6 = arith.constant 0.000000e+00 : f32
    %14 = vector.shape_cast %5 : vector<32x1xi1> to vector<32x1xi1>
    %15 = vector.broadcast %14 : vector<32x1xi1> to vector<32x128xi1>
    %16 = vector.broadcast %cst_6 : f32 to vector<32x128xf32>
    %17 = arith.select %15, %13, %16 : vector<32x128xi1>, vector<32x128xf32>
    %c2_i32 = arith.constant 2 : i32
    %18 = vector.broadcast %c2_i32 : i32 to vector<32x1xi32>
    %19 = arith.cmpi sge, %3, %18 : vector<32x1xi32>
    %c2_i32_7 = arith.constant 2 : i32
    %20 = tpu.dynamic_rotate %17 by %c2_i32_7 dim 0 : vector<32x128xf32>, i32 -> vector<32x128xf32>
    %cst_8 = arith.constant 0.000000e+00 : f32
    %21 = vector.shape_cast %19 : vector<32x1xi1> to vector<32x1xi1>
    %22 = vector.broadcast %21 : vector<32x1xi1> to vector<32x128xi1>
    %23 = vector.broadcast %cst_8 : f32 to vector<32x128xf32>
    %24 = arith.select %22, %20, %23 : vector<32x128xi1>, vector<32x128xf32>
    %c14_i32 = arith.constant 14 : i32
    %25 = vector.broadcast %c14_i32 : i32 to vector<32x1xi32>
    %26 = arith.cmpi slt, %3, %25 : vector<32x1xi32>
    %c30_i32 = arith.constant 30 : i32
    %27 = tpu.dynamic_rotate %17 by %c30_i32 dim 0 : vector<32x128xf32>, i32 -> vector<32x128xf32>
    %cst_9 = arith.constant 0.000000e+00 : f32
    %28 = vector.shape_cast %26 : vector<32x1xi1> to vector<32x1xi1>
    %29 = vector.broadcast %28 : vector<32x1xi1> to vector<32x128xi1>
    %30 = vector.broadcast %cst_9 : f32 to vector<32x128xf32>
    %31 = arith.select %29, %27, %30 : vector<32x128xi1>, vector<32x128xf32>
    %32 = tpu.concatenate %24, %17, %31 in 1 : vector<32x128xf32>, vector<32x128xf32>, vector<32x128xf32> -> vector<32x384xf32>
    %c0_10 = arith.constant 0 : index
    %c0_11 = arith.constant 0 : index
    %33 = vector.load %arg4[%c0_10, %c0_11] : memref<384x128xf32, #tpu.memory_space<vmem>>, vector<384x128xf32>
    %cst_12 = arith.constant dense<0.000000e+00> : vector<32x128xf32>
    %34 = tpu.matmul %32, %33, %cst_12 {dimension_numbers = #tpu.dot_dimension_numbers<[1], [0], [0], [1], [0, 0, 1, 1], [], []>} : vector<32x384xf32>, vector<384x128xf32>, vector<32x128xf32> -> vector<32x128xf32>
    %c0_13 = arith.constant 0 : index
    %c0_14 = arith.constant 0 : index
    %35 = vector.load %arg5[%c0_13, %c0_14] : memref<1x128xf32, #tpu.memory_space<vmem>>, vector<1x128xf32>
    %36 = vector.broadcast %35 : vector<1x128xf32> to vector<32x128xf32>
    %37 = arith.mulf %34, %36 : vector<32x128xf32>
    %c0_15 = arith.constant 0 : index
    %c0_16 = arith.constant 0 : index
    %38 = vector.load %arg6[%c0_15, %c0_16] : memref<1x128xf32, #tpu.memory_space<vmem>>, vector<1x128xf32>
    %39 = vector.broadcast %38 : vector<1x128xf32> to vector<32x128xf32>
    %40 = arith.addf %37, %39 : vector<32x128xf32>
    %cst_17 = arith.constant 0.000000e+00 : f32
    %41 = vector.broadcast %cst_17 : f32 to vector<32x128xf32>
    %42 = arith.maximumf %40, %41 : vector<32x128xf32>
    %cst_18 = arith.constant 0.000000e+00 : f32
    %43 = vector.shape_cast %5 : vector<32x1xi1> to vector<32x1xi1>
    %44 = vector.broadcast %43 : vector<32x1xi1> to vector<32x128xi1>
    %45 = vector.broadcast %cst_18 : f32 to vector<32x128xf32>
    %46 = arith.select %44, %42, %45 : vector<32x128xi1>, vector<32x128xf32>
    %c1_i32 = arith.constant 1 : i32
    %47 = vector.broadcast %c1_i32 : i32 to vector<32x1xi32>
    %48 = arith.cmpi sge, %3, %47 : vector<32x1xi32>
    %c1_i32_19 = arith.constant 1 : i32
    %49 = tpu.dynamic_rotate %46 by %c1_i32_19 dim 0 : vector<32x128xf32>, i32 -> vector<32x128xf32>
    %cst_20 = arith.constant 0.000000e+00 : f32
    %50 = vector.shape_cast %48 : vector<32x1xi1> to vector<32x1xi1>
    %51 = vector.broadcast %50 : vector<32x1xi1> to vector<32x128xi1>
    %52 = vector.broadcast %cst_20 : f32 to vector<32x128xf32>
    %53 = arith.select %51, %49, %52 : vector<32x128xi1>, vector<32x128xf32>
    %c15_i32 = arith.constant 15 : i32
    %54 = vector.broadcast %c15_i32 : i32 to vector<32x1xi32>
    %55 = arith.cmpi slt, %3, %54 : vector<32x1xi32>
    %c31_i32 = arith.constant 31 : i32
    %56 = tpu.dynamic_rotate %46 by %c31_i32 dim 0 : vector<32x128xf32>, i32 -> vector<32x128xf32>
    %cst_21 = arith.constant 0.000000e+00 : f32
    %57 = vector.shape_cast %55 : vector<32x1xi1> to vector<32x1xi1>
    %58 = vector.broadcast %57 : vector<32x1xi1> to vector<32x128xi1>
    %59 = vector.broadcast %cst_21 : f32 to vector<32x128xf32>
    %60 = arith.select %58, %56, %59 : vector<32x128xi1>, vector<32x128xf32>
    %61 = tpu.concatenate %53, %46, %60 in 1 : vector<32x128xf32>, vector<32x128xf32>, vector<32x128xf32> -> vector<32x384xf32>
    %c0_22 = arith.constant 0 : index
    %c0_23 = arith.constant 0 : index
    %62 = vector.load %arg7[%c0_22, %c0_23] : memref<384x128xf32, #tpu.memory_space<vmem>>, vector<384x128xf32>
    %cst_24 = arith.constant dense<0.000000e+00> : vector<32x128xf32>
    %63 = tpu.matmul %61, %62, %cst_24 {dimension_numbers = #tpu.dot_dimension_numbers<[1], [0], [0], [1], [0, 0, 1, 1], [], []>} : vector<32x384xf32>, vector<384x128xf32>, vector<32x128xf32> -> vector<32x128xf32>
    %64 = arith.addf %63, %0 : vector<32x128xf32>
    %c0_25 = arith.constant 0 : index
    %c0_26 = arith.constant 0 : index
    %65 = vector.load %arg8[%c0_25, %c0_26] : memref<32x128xf32, #tpu.memory_space<vmem>>, vector<32x128xf32>
    tpu.vector_store %arg8[%c0_25, %c0_26], %64 {strides = array<i32>} : memref<32x128xf32, #tpu.memory_space<vmem>>, vector<32x128xf32>,
    return
  }
  func.func @transform_0(%arg0: i32) -> (i32, i32) {
    %c0_i32 = arith.constant 0 : i32
    %c0_i32_0 = arith.constant 0 : i32
    return %arg0, %c0_i32 : i32, i32
  }
  func.func @transform_1(%arg0: i32) -> (i32, i32) {
    %c0_i32 = arith.constant 0 : i32
    %c0_i32_0 = arith.constant 0 : i32
    %c0_i32_1 = arith.constant 0 : i32
    return %c0_i32, %c0_i32_0 : i32, i32
  }
  func.func @transform_2(%arg0: i32) -> (i32, i32) {
    %c0_i32 = arith.constant 0 : i32
    %c0_i32_0 = arith.constant 0 : i32
    %c0_i32_1 = arith.constant 0 : i32
    return %c0_i32, %c0_i32_0 : i32, i32
  }
  func.func @transform_3(%arg0: i32) -> (i32, i32) {
    %c0_i32 = arith.constant 0 : i32
    %c0_i32_0 = arith.constant 0 : i32
    %c0_i32_1 = arith.constant 0 : i32
    return %c0_i32, %c0_i32_0 : i32, i32
  }
  func.func @transform_4(%arg0: i32) -> (i32, i32) {
    %c0_i32 = arith.constant 0 : i32
    %c0_i32_0 = arith.constant 0 : i32
    %c0_i32_1 = arith.constant 0 : i32
    return %c0_i32, %c0_i32_0 : i32, i32
  }
  func.func @transform_5(%arg0: i32) -> (i32, i32) {
    %c0_i32 = arith.constant 0 : i32
    %c0_i32_0 = arith.constant 0 : i32
    %c0_i32_1 = arith.constant 0 : i32
    return %c0_i32, %c0_i32_0 : i32, i32
  }
  func.func @transform_6(%arg0: i32) -> (i32, i32) {
    %c0_i32 = arith.constant 0 : i32
    %c0_i32_0 = arith.constant 0 : i32
    %c0_i32_1 = arith.constant 0 : i32
    return %c0_i32, %c0_i32_0 : i32, i32
  }
  func.func @transform_7(%arg0: i32) -> (i32, i32) {
    %c0_i32 = arith.constant 0 : i32
    %c0_i32_0 = arith.constant 0 : i32
    return %arg0, %c0_i32 : i32, i32
  }
}

</mosaic_0001>

<bundles_post_ra>
// kernel: tpu_custom_call.1
= control target key start
LH: loop header
LB: loop body
LE: loop exit
PB: predicated region body
PF: predicated region fallthrough
CT: control target
= control target key end

     0   :  { %12 = vsyncpa [#allocation3], 0  ;;  %s1411_s0 = inlined_call_operand.hbm [shape: f32[32,128], index: 0, kind: input, shape index: {}]   ;;  %s1412_s1 = inlined_call_operand.vmem [shape: f32[1,128], index: 1, kind: input, shape index: {}]   ;;  %s1413_s2 = inlined_call_operand.vmem [shape: f32[1,128], index: 2, kind: input, shape index: {}]   ;;  %s1414_s3 = inlined_call_operand.hbm [shape: f32[384,128], index: 3, kind: input, shape index: {}]   ;;  %s1415_s4 = inlined_call_operand.vmem [shape: f32[1,128], index: 4, kind: input, shape index: {}]   ;;  %s1416_s5 = inlined_call_operand.vmem [shape: f32[1,128], index: 5, kind: input, shape index: {}]   ;;  %s1417_s6 = inlined_call_operand.hbm [shape: f32[384,128], index: 6, kind: input, shape index: {}]   ;;  %s1418_s7 = inlined_call_operand.hbm [shape: f32[32,128], index: 7, kind: output, shape index: {}]  }
   0x1   :  { %13 = vsyncpa [#allocation6], 0 }
   0x2   :  { %14 = vsyncpa [#allocation4], 0  ;;  %s1179_s24 = smov [#allocation5]   ;;  %s1180_s26 = smov [#allocation2]  }
   0x3   :  { %s36_s25 = sshll.u32 %s1179_s24, 4  ;;  %s20_s27 = sshll.u32 %s1180_s26, 4  ;;  %s37_s25 = int_to_ptr.vmem [resolvable:$true] %s36_s25  ;;  %s1225_s27 = int_to_ptr.vmem [resolvable:$true] %s20_s27 }
   0x4   :  { %s1085_s30 = scalar_lea.hbm %s1414_s3, 6144 }
   0x5   :  { %p1086_p0 = scmp.ne.s32.totalorder %s1414_s3, %s1085_s30  ;;  %p1089_p1 = scmp.lt.u32.totalorder %s1085_s30, %s1414_s3 }
   0x7   :  { %p1091_p2 = pnand %p1089_p1, %p1086_p0 }
   0x9   :  { %1094 = shalt.err (!%p1091_p2)
}
   0xa   :  { %s1095_s12 = scalar_lea.vmem %s37_s25, 6144  ;;  %p1100_p4 = scmp.lt.s32.totalorder %s37_s25, %s37_s25 }
   0xb   :  { %p1096_p3 = scmp.ne.s32.totalorder %s37_s25, %s1095_s12  ;;  %p1101_p5 = scmp.lt.s32.totalorder %s1095_s12, %s1095_s12 }
   0xd   :  { %p1102_p6 = por %p1101_p5, %p1100_p4 }
   0xf   :  { %p1103_p7 = pnand %p1102_p6, %p1096_p3 }
  0x11   :  { %1106 = shalt.err (!%p1103_p7)
}
  0x12   :  { %s1181_s13 = smov 128   ;;  %s1182_s14 = smov 8  }
  0x13   :  { %42 = dma.hbm_to_vmem [thread:$0]  %s1414_s3, 6144, %s37_s25, [#allocation6], %s1181_s13, %s1181_s13, %s1182_s14  }
  0x14   :  { %s1107_s19 = scalar_lea.hbm %s1411_s0, 512 }
  0x15   :  { %p1108_p8 = scmp.ne.s32.totalorder %s1411_s0, %s1107_s19  ;;  %p1111_p9 = scmp.lt.u32.totalorder %s1107_s19, %s1411_s0 }
  0x17   :  { %p1113_p10 = pnand %p1111_p9, %p1108_p8 }
  0x19   :  { %1116 = shalt.err (!%p1113_p10)
}
  0x1a   :  { %s1117_s24 = scalar_lea.vmem %s1225_s27, 512  ;;  %p1122_p12 = scmp.lt.s32.totalorder %s1225_s27, %s1225_s27 }
  0x1b   :  { %p1118_p11 = scmp.ne.s32.totalorder %s1225_s27, %s1117_s24  ;;  %p1123_p13 = scmp.lt.s32.totalorder %s1117_s24, %s1117_s24 }
  0x1d   :  { %p1124_p0 = por %p1123_p13, %p1122_p12 }
  0x1f   :  { %p1125_p1 = pnand %p1124_p0, %p1118_p11 }
  0x21   :  { %1128 = shalt.err (!%p1125_p1)
}
  0x22   :  { %26 = dma.hbm_to_vmem [thread:$0]  %s1411_s0, 512, %s1225_s27, [#allocation3], %s1181_s13, %s1181_s13, %s1182_s14  }
  0x23   :  { %s1183_s26 = smov [#allocation7]   ;;  %s1129_s8 = scalar_lea.hbm %s1417_s6, 6144 }
  0x24   :  { %s52_s28 = sshll.u32 %s1183_s26, 4  ;;  %p1130_p2 = scmp.ne.s32.totalorder %s1417_s6, %s1129_s8  ;;  %s53_s28 = int_to_ptr.vmem [resolvable:$true] %s52_s28 }
  0x25   :  { %p1133_p3 = scmp.lt.u32.totalorder %s1129_s8, %s1417_s6 }
  0x27   :  { %p1135_p4 = pnand %p1133_p3, %p1130_p2 }
  0x29   :  { %1138 = shalt.err (!%p1135_p4)
}
  0x2a   :  { %s1139_s15 = scalar_lea.vmem %s53_s28, 6144  ;;  %p1144_p6 = scmp.lt.s32.totalorder %s53_s28, %s53_s28 }
  0x2b   :  { %p1140_p5 = scmp.ne.s32.totalorder %s53_s28, %s1139_s15  ;;  %p1145_p7 = scmp.lt.s32.totalorder %s1139_s15, %s1139_s15 }
  0x2d   :  { %p1146_p8 = por %p1145_p7, %p1144_p6 }
  0x2f   :  { %p1147_p9 = pnand %p1146_p8, %p1140_p5 }
  0x31   :  { %1150 = shalt.err (!%p1147_p9)
}
  0x32   :  { %58 = dma.hbm_to_vmem [thread:$0]  %s1417_s6, 6144, %s53_s28, [#allocation6], %s1181_s13, %s1181_s13, %s1182_s14  }
  0x33   :  { %1173 = dma.done.wait [#allocation3], 512  }
  0x34   :  { %1174 = vsyncadd [#allocation3], 4294966784 }
  0x35   :  { %1175 = dma.done.wait [#allocation6], 12288  }
  0x36   :  { %1176 = vsyncadd [#allocation6], 4294955008  ;;  %v213_v0 = vld [vmem:[#allocation5 + $0x80] sm:$0xff]  ;;  %v214_v1 = vld [vmem:[#allocation5 + $0x88] sm:$0xff]  ;;  %v72_v58 = vlaneseq }
  0x37   :  { %v197_v2 = vld [vmem:[#allocation5] sm:$0xff]  ;;  %v951_v3 = vpack.c.bf16 %v214_v1, %v213_v0  ;;  %v198_v4 = vld [vmem:[#allocation5 + $0x8] sm:$0xff]  ;;  %v215_v9 = vld [vmem:[#allocation5 + $0x90] sm:$0xff] }
  0x38   :  { %v229_v5 = vld [vmem:[#allocation5 + $0x100] sm:$0xff]  ;;  %v230_v6 = vld [vmem:[#allocation5 + $0x108] sm:$0xff]  ;;  %v953_v7 = vpack.c.bf16 %v198_v4, %v197_v2  ;;  %v216_v10 = vld [vmem:[#allocation5 + $0x98] sm:$0xff] }
  0x39   :  { %v983_v8 = vpack.c.bf16 %v230_v6, %v229_v5  ;;  %v199_v11 = vld [vmem:[#allocation5 + $0x10] sm:$0xff]  ;;  %952 = vmatprep.subr.bf16.mxu0 %v951_v3  ;;  %v955_v12 = vpack.c.bf16 %v216_v10, %v215_v9  ;;  %v200_v13 = vld [vmem:[#allocation5 + $0x18] sm:$0xff]  ;;  %v217_v18 = vld [vmem:[#allocation5 + $0xa0] sm:$0xff] }
  0x3a   :  { %v231_v14 = vld [vmem:[#allocation5 + $0x110] sm:$0xff]  ;;  %v232_v15 = vld [vmem:[#allocation5 + $0x118] sm:$0xff]  ;;  %954 = vmatpush3.bf16.msra.mxu0 %v953_v7  ;;  %v957_v16 = vpack.c.bf16 %v200_v13, %v199_v11  ;;  %v218_v19 = vld [vmem:[#allocation5 + $0xa8] sm:$0xff] }
  0x3b   :  { %984 = vmatprep.subr.bf16.mxu1 %v983_v8  ;;  %v987_v17 = vpack.c.bf16 %v232_v15, %v231_v14  ;;  %v201_v20 = vld [vmem:[#allocation5 + $0x20] sm:$0xff]  ;;  %956 = vmatprep.subr.bf16.mxu0 %v955_v12  ;;  %v959_v21 = vpack.c.bf16 %v218_v19, %v217_v18  ;;  %v202_v22 = vld [vmem:[#allocation5 + $0x28] sm:$0xff]  ;;  %v219_v26 = vld [vmem:[#allocation5 + $0xb0] sm:$0xff]  ;;  %v1295_v12 = vshrl.u32 %v72_v58, 7 }
  0x3c   :  { %986 = vmatpush3.bf16.msra.mxu1 %v983_v8  ;;  %v233_v23 = vld [vmem:[#allocation5 + $0x120] sm:$0xff]  ;;  %v234_v24 = vld [vmem:[#allocation5 + $0x128] sm:$0xff]  ;;  %v220_v27 = vld [vmem:[#allocation5 + $0xb8] sm:$0xff]  ;;  %v961_v30 = vpack.c.bf16 %v202_v22, %v201_v20 }
  0x3d   :  { %988 = vmatprep.subr.bf16.mxu1 %v987_v17  ;;  %v991_v25 = vpack.c.bf16 %v234_v24, %v233_v23  ;;  %v235_v28 = vld [vmem:[#allocation5 + $0x130] sm:$0xff]  ;;  %v236_v29 = vld [vmem:[#allocation5 + $0x138] sm:$0xff]  ;;  %v963_v31 = vpack.c.bf16 %v220_v27, %v219_v26  ;;  %v221_v35 = vld [vmem:[#allocation5 + $0xc0] sm:$0xff]  ;;  %vm180_vm0 = vcmp.lt.s32.totalorder %v1295_v12, 6  ;;  %v1308_v27 = vadd.s32 8, %v1295_v12 }
  0x3e   :  { %958 = vmatpush3.bf16.msra.mxu0 %v957_v16  ;;  %v203_v32 = vld [vmem:[#allocation5 + $0x30] sm:$0xff]  ;;  %v204_v33 = vld [vmem:[#allocation5 + $0x38] sm:$0xff]  ;;  %v995_v34 = vpack.c.bf16 %v236_v29, %v235_v28  ;;  %v222_v36 = vld [vmem:[#allocation5 + $0xc8] sm:$0xff]  ;;  %vm155_vm1 = vcmp.lt.s32.totalorder %v1295_v12, 2  ;;  %vm478_vm6 = vcmp.lt.s32.totalorder %v1295_v12, 7  ;;  %vm453_vm7 = vcmp.lt.s32.totalorder %v1295_v12, 1 }
  0x3f   :  { %960 = vmatprep.subr.bf16.mxu0 %v959_v21  ;;  %v237_v37 = vld [vmem:[#allocation5 + $0x140] sm:$0xff]  ;;  %v238_v38 = vld [vmem:[#allocation5 + $0x148] sm:$0xff]  ;;  %v965_v39 = vpack.c.bf16 %v204_v33, %v203_v32  ;;  %v967_v40 = vpack.c.bf16 %v222_v36, %v221_v35  ;;  %v223_v43 = vld [vmem:[#allocation5 + $0xd0] sm:$0xff]  ;;  %v81_v33 = vand.u32 15, %v1295_v12 }
  0x40   :  { %990 = vmatpush3.bf16.msra.mxu1 %v987_v17  ;;  %v205_v41 = vld [vmem:[#allocation5 + $0x40] sm:$0xff]  ;;  %v206_v42 = vld [vmem:[#allocation5 + $0x48] sm:$0xff]  ;;  %v999_v44 = vpack.c.bf16 %v238_v38, %v237_v37  ;;  %v224_v45 = vld [vmem:[#allocation5 + $0xd8] sm:$0xff] }
  0x41   :  { %992 = vmatprep.subr.bf16.mxu1 %v991_v25  ;;  %v239_v46 = vld [vmem:[#allocation5 + $0x150] sm:$0xff]  ;;  %v240_v47 = vld [vmem:[#allocation5 + $0x158] sm:$0xff]  ;;  %v969_v50 = vpack.c.bf16 %v206_v42, %v205_v41  ;;  %v1277_v51 = vld [vmem:[#allocation2] sm:$0xff]  ;;  %v971_v54 = vpack.c.bf16 %v224_v45, %v223_v43  ;;  %v1323_v41 = vadd.s32 24, %v1295_v12  ;;  %vm147_vm2 = vcmp.ge.s32.totalorder %v81_v33, 2 }
  0x42   :  { %962 = vmatpush3.bf16.msra.mxu0 %v961_v30  ;;  %v207_v48 = vld [vmem:[#allocation5 + $0x50] sm:$0xff]  ;;  %v208_v49 = vld [vmem:[#allocation5 + $0x58] sm:$0xff]  ;;  %v1003_v55 = vpack.c.bf16 %v240_v47, %v239_v46  ;;  %v735_v56 = vld [vmem:[%s1412_s1] ss:$0 sm:$0xff]  ;;  %vm445_vm9 = vcmp.ge.s32.totalorder %v81_v33, 1 }
  0x43   :  { %964 = vmatprep.subr.bf16.mxu0 %v963_v31  ;;  %v1279_v52 = vld [vmem:[#allocation2 + $0x10] sm:$0xff]  ;;  %v1281_v53 = vld [vmem:[#allocation2 + $0x18] sm:$0xff]  ;;  %v736_v57 = vld [vmem:[%s1413_s2] ss:$0 sm:$0xff]  ;;  %v116_v62 = vmul.f32 %v735_v56, %v1277_v51  ;;  %v973_v4 = vpack.c.bf16 %v208_v49, %v207_v48  ;;  %v102_v58 = vand.u32 15, %v1323_v41 }
  0x44   :  { %994 = vmatpush3.bf16.msra.mxu1 %v991_v25  ;;  %v1289_v59 = vld [vmem:[#allocation2 + $0x8] sm:$0xff]  ;;  %v225_v60 = vld [vmem:[#allocation5 + $0xe0] sm:$0xff]  ;;  %v118_v63 = vmul.f32 %v735_v56, %v1279_v52  ;;  %v119_v0 = vmul.f32 %v735_v56, %v1281_v53  ;;  %v227_v14 = vld [vmem:[#allocation5 + $0xf0] sm:$0xff] }
  0x45   :  { %996 = vmatprep.subr.bf16.mxu1 %v995_v34  ;;  %v226_v61 = vld [vmem:[#allocation5 + $0xe8] sm:$0xff]  ;;  %v117_v1 = vmul.f32 %v735_v56, %v1289_v59  ;;  %v241_v2 = vld [vmem:[#allocation5 + $0x160] sm:$0xff]  ;;  %v127_v5 = vadd.f32 %v736_v57, %v116_v62  ;;  %v228_v15 = vld [vmem:[#allocation5 + $0xf8] sm:$0xff]  ;;  %vm175_vm4 = vcmp.lt.s32.totalorder %v102_v58, 14  ;;  %vm473_vm10 = vcmp.lt.s32.totalorder %v102_v58, 15 }
  0x46   :  { %966 = vmatpush3.bf16.msra.mxu0 %v965_v39  ;;  %v242_v3 = vld [vmem:[#allocation5 + $0x168] sm:$0xff]  ;;  %v130_v6 = vadd.f32 %v736_v57, %v119_v0  ;;  %v975_v8 = vpack.c.bf16 %v226_v61, %v225_v60  ;;  %v209_v9 = vld [vmem:[#allocation5 + $0x60] sm:$0xff]  ;;  %v129_v11 = vadd.f32 %v736_v57, %v118_v63  ;;  %v243_v18 = vld [vmem:[#allocation5 + $0x170] sm:$0xff]  ;;  %v979_v24 = vpack.c.bf16 %v228_v15, %v227_v14 }
  0x47   :  { %968 = vmatprep.subr.bf16.mxu0 %v967_v40  ;;  %v128_v7 = vadd.f32 %v736_v57, %v117_v1  ;;  %v210_v10 = vld [vmem:[#allocation5 + $0x68] sm:$0xff]  ;;  %v1007_v13 = vpack.c.bf16 %v242_v3, %v241_v2  ;;  %v1297_v16 = vmax.f32 %v127_v5, 0.0  ;;  %v244_v19 = vld [vmem:[#allocation5 + $0x178] sm:$0xff]  ;;  %v211_v25 = vld [vmem:[#allocation5 + $0x70] sm:$0xff]  ;;  %v88_v39 = vand.u32 15, %v1308_v27 }
  0x48   :  { %998 = vmatpush3.bf16.msra.mxu1 %v995_v34  ;;  %v977_v20 = vpack.c.bf16 %v210_v10, %v209_v9  ;;  %v1303_v21 = vmax.f32 %v130_v6, 0.0  ;;  %v212_v26 = vld [vmem:[#allocation5 + $0x78] sm:$0xff]  ;;  %v1310_v28 = vmax.f32 %v129_v11, 0.0  ;;  %v1011_v29 = vpack.c.bf16 %v244_v19, %v243_v18  ;;  %v511_v31 = vld [vmem:[#allocation7 + $0x80] sm:$0xff]  ;;  %v512_v32 = vld [vmem:[#allocation7 + $0x88] sm:$0xff] }
  0x49   :  { %1000 = vmatprep.subr.bf16.mxu1 %v999_v44  ;;  %v1299_v17 = vmax.f32 %v128_v7, 0.0  ;;  %309 = vmatprep.mubr.f32.mxu0 %v1297_v16  ;;  %v176_v22 = vrot.slane %v1297_v16, 2  ;;  %v527_v34 = vld [vmem:[#allocation7 + $0x100] sm:$0xff]  ;;  %v528_v35 = vld [vmem:[#allocation7 + $0x108] sm:$0xff]  ;;  %v981_v36 = vpack.c.bf16 %v212_v26, %v211_v25  ;;  %v151_v37 = vrot.slane %v1297_v16, 6  ;;  %v529_v45 = vld [vmem:[#allocation7 + $0x110] sm:$0xff] }
  0x4a   :  { %970 = vmatpush3.bf16.msra.mxu0 %v969_v50  ;;  %v154_v38 = vrot.slane %v1303_v21, 6  ;;  %v178_v40 = vrot.slane %v1310_v28, 2  ;;  %v1015_v42 = vpack.c.bf16 %v512_v32, %v511_v31  ;;  %v179_v43 = vrot.slane %v1303_v21, 2  ;;  %v530_v46 = vld [vmem:[#allocation7 + $0x118] sm:$0xff]  ;;  %v495_v47 = vld [vmem:[#allocation7] sm:$0xff]  ;;  %v496_v48 = vld [vmem:[#allocation7 + $0x8] sm:$0xff] }
  0x4b   :  { %972 = vmatprep.subr.bf16.mxu0 %v971_v54  ;;  %v177_v23 = vrot.slane %v1299_v17, 2  ;;  %v152_v50 = vrot.slane %v1299_v17, 6  ;;  %v1332_v54 = vadd.s32 16, %v1295_v12  ;;  %v514_v56 = vld [vmem:[#allocation7 + $0x98] sm:$0xff]  ;;  %vm173_vm3 = vcmp.lt.s32.totalorder %v88_v39, 14  ;;  %v531_v0 = vld [vmem:[#allocation7 + $0x120] sm:$0xff] }
  0x4c   :  { %1002 = vmatpush3.bf16.msra.mxu1 %v999_v44  ;;  %v1047_v44 = vpack.c.bf16 %v528_v35, %v527_v34  ;;  %v159_v49 = vsel %vm155_vm1, %v154_v38, %v151_v37  ;;  %v181_v60 = vsel %vm180_vm0, %v178_v40, %v179_v43  ;;  %v1051_v61 = vpack.c.bf16 %v530_v46, %v529_v45  ;;  %v532_v1 = vld [vmem:[#allocation7 + $0x128] sm:$0xff]  ;;  %v497_v9 = vld [vmem:[#allocation7 + $0x10] sm:$0xff]  ;;  %v498_v10 = vld [vmem:[#allocation7 + $0x18] sm:$0xff] }
  0x4d   :  { %1004 = vmatprep.subr.bf16.mxu1 %v1003_v55  ;;  %v183_v30 = vsel %vm180_vm0, %v176_v22, %v177_v23  ;;  %v182_v57 = vsel %vm180_vm0, %v177_v23, %v178_v40  ;;  %v1017_v62 = vpack.c.bf16 %v496_v48, %v495_v47  ;;  %v158_v2 = vsel %vm155_vm1, %v151_v37, %v152_v50  ;;  %v516_v14 = vld [vmem:[#allocation7 + $0xa8] sm:$0xff]  ;;  %v533_v15 = vld [vmem:[#allocation7 + $0x130] sm:$0xff]  ;;  %v499_v18 = vld [vmem:[#allocation7 + $0x20] sm:$0xff] }
  0x4e   :  { %974 = vmatpush3.bf16.msra.mxu0 %v973_v4  ;;  %907 = vmatprep.mubr.f32.mxu1 %v183_v30  ;;  %v95_v3 = vand.u32 15, %v1332_v54  ;;  %v153_v4 = vrot.slane %v1310_v28, 6  ;;  %v184_v5 = vsel %vm180_vm0, %v179_v43, %v176_v22  ;;  %v1055_v6 = vpack.c.bf16 %v532_v1, %v531_v0  ;;  %v500_v19 = vld [vmem:[#allocation7 + $0x28] sm:$0xff]  ;;  %v518_v23 = vld [vmem:[#allocation7 + $0xb8] sm:$0xff]  ;;  %v535_v25 = vld [vmem:[#allocation7 + $0x140] sm:$0xff] }
  0x4f   :  { %976 = vmatprep.subr.bf16.mxu0 %v975_v8  ;;  %v1021_v11 = vpack.c.bf16 %v498_v10, %v497_v9  ;;  %v1025_v22 = vpack.c.bf16 %v500_v19, %v499_v18  ;;  %v536_v26 = vld [vmem:[#allocation7 + $0x148] sm:$0xff]  ;;  %v502_v30 = vld [vmem:[#allocation7 + $0x38] sm:$0xff]  ;;  %v519_v32 = vld [vmem:[#allocation7 + $0xc0] sm:$0xff]  ;;  %vm471_vm8 = vcmp.lt.s32.totalorder %v88_v39, 15 }
  0x50   :  { %1006 = vmatpush3.bf16.msra.mxu1 %v1003_v55  ;;  %v513_v55 = vld [vmem:[#allocation7 + $0x90] sm:$0xff]  ;;  %vm149_vm5 = vcmp.ge.s32.totalorder %v95_v3, 2  ;;  %v157_v7 = vsel %vm155_vm1, %v152_v50, %v153_v4  ;;  %v156_v8 = vsel %vm155_vm1, %v153_v4, %v154_v38  ;;  %v520_v34 = vld [vmem:[#allocation7 + $0xc8] sm:$0xff]  ;;  %v538_v37 = vld [vmem:[#allocation7 + $0x158] sm:$0xff]  ;;  %vm447_vm11 = vcmp.ge.s32.totalorder %v95_v3, 1 }
  0x51   :  { %1008 = vmatprep.subr.bf16.mxu1 %v1007_v13  ;;  %v1019_v63 = vpack.c.bf16 %v514_v56, %v513_v55  ;;  %v537_v35 = vld [vmem:[#allocation7 + $0x150] sm:$0xff]  ;;  %v503_v38 = vld [vmem:[#allocation7 + $0x40] sm:$0xff]  ;;  %v504_v40 = vld [vmem:[#allocation7 + $0x48] sm:$0xff] }
  0x52   :  { %978 = vmatpush3.bf16.msra.mxu0 %v977_v20  ;;  %v1033_v43 = vpack.c.bf16 %v504_v40, %v503_v38  ;;  %v522_v45 = vld [vmem:[#allocation7 + $0xd8] sm:$0xff]  ;;  %v539_v46 = vld [vmem:[#allocation7 + $0x160] sm:$0xff]  ;;  %v540_v48 = vld [vmem:[#allocation7 + $0x168] sm:$0xff] }
  0x53   :  { %980 = vmatprep.subr.bf16.mxu0 %v979_v24  ;;  %v506_v50 = vld [vmem:[#allocation7 + $0x58] sm:$0xff]  ;;  %v1071_v55 = vpack.c.bf16 %v540_v48, %v539_v46  ;;  %v507_v0 = vld [vmem:[#allocation7 + $0x60] sm:$0xff]  ;;  %v508_v1 = vld [vmem:[#allocation7 + $0x68] sm:$0xff] }
  0x54   :  { %1010 = vmatpush3.bf16.msra.mxu1 %v1007_v13  ;;  %v515_v13 = vld [vmem:[#allocation7 + $0xa0] sm:$0xff]  ;;  %v1041_v4 = vpack.c.bf16 %v508_v1, %v507_v0  ;;  %v510_v9 = vld [vmem:[#allocation7 + $0x78] sm:$0xff] }
  0x55   :  { %1012 = vmatprep.subr.bf16.mxu1 %v1011_v29  ;;  %v1023_v16 = vpack.c.bf16 %v516_v14, %v515_v13 }
  0x56   :  { %982 = vmatpush3.bf16.msra.mxu0 %v981_v36  ;;  %v1031_v36 = vpack.c.bf16 %v520_v34, %v519_v32 }
  0x57   :  { %1016 = vmatprep.subr.bf16.mxu0 %v1015_v42  ;;  %v1067_v42 = vpack.c.bf16 %v538_v37, %v537_v35 }
  0x58   :  { %1014 = vmatpush3.bf16.msra.mxu1 %v1011_v29  ;;  %v1063_v29 = vpack.c.bf16 %v536_v26, %v535_v25 }
  0x59   :  { %1048 = vmatprep.subr.bf16.mxu1 %v1047_v44  ;;  %737 = vmatmul.mubr.msk.f32.vlgmr.msra.gmra.mrb[0].mxu0 %vm147_vm2, %v159_v49  ;;  %v505_v49 = vld [vmem:[#allocation7 + $0x50] sm:$0xff] }
  0x5a   :  { %314 = vmatprep.mubr.f32.mxu0 %v1299_v17  ;;  %1018 = vmatpush3.bf16.msra.mxu0 %v1017_v62  ;;  %v534_v17 = vld [vmem:[#allocation7 + $0x138] sm:$0xff]  ;;  %v1037_v56 = vpack.c.bf16 %v506_v50, %v505_v49 }
  0x5b   :  { %908 = vmatmul.mubr.msk.f32.vlgmr.msra.gmra.mrb[0].mxu1 %vm173_vm3, %v182_v57  ;;  %1020 = vmatprep.subr.bf16.mxu0 %v1019_v63  ;;  %v1059_v20 = vpack.c.bf16 %v534_v17, %v533_v15  ;;  %v523_v57 = vld [vmem:[#allocation7 + $0xe0] sm:$0xff]  ;;  %v542_v63 = vld [vmem:[#allocation7 + $0x178] sm:$0xff] }
  0x5c   :  { %910 = vmatprep.mubr.f32.mxu1 %v181_v60  ;;  %1050 = vmatpush3.bf16.msra.mxu1 %v1047_v44  ;;  %v521_v44 = vld [vmem:[#allocation7 + $0xd0] sm:$0xff]  ;;  %v524_v60 = vld [vmem:[#allocation7 + $0xe8] sm:$0xff]  ;;  %v741_v17 = vld [vmem:[%s1415_s4] ss:$0 sm:$0xff]  ;;  %s1184_s4 = smov [#allocation8]  }
  0x5d   :  { %1052 = vmatprep.subr.bf16.mxu1 %v1051_v61  ;;  %315 = vmatmul.mubr.f32.gmra.mrb[2].mxu0 %v158_v2  ;;  %v1035_v47 = vpack.c.bf16 %v522_v45, %v521_v44  ;;  %v1039_v62 = vpack.c.bf16 %v524_v60, %v523_v57 }
  0x5e   :  { %319 = vmatprep.mubr.f32.mxu0 %v1310_v28  ;;  %1022 = vmatpush3.bf16.msra.mxu0 %v1021_v11  ;;  %v501_v28 = vld [vmem:[#allocation7 + $0x30] sm:$0xff] }
  0x5f   :  { %911 = vmatmul.mubr.msk.f32.gmra.mrb[2].mxu1 %vm175_vm4, %v184_v5  ;;  %1024 = vmatprep.subr.bf16.mxu0 %v1023_v16  ;;  %v1029_v31 = vpack.c.bf16 %v502_v30, %v501_v28  ;;  %v525_v5 = vld [vmem:[#allocation7 + $0xf0] sm:$0xff] }
  0x60   :  { %1054 = vmatpush3.bf16.msra.mxu1 %v1051_v61  ;;  %v541_v61 = vld [vmem:[#allocation7 + $0x170] sm:$0xff] }
  0x61   :  { %1056 = vmatprep.subr.bf16.mxu1 %v1055_v6  ;;  %738 = vmatmul.mubr.msk.f32.gmra.mrb[4].mxu0 %vm149_vm5, %v157_v7  ;;  %v1075_v2 = vpack.c.bf16 %v542_v63, %v541_v61 }
  0x62   :  { %324 = vmatprep.mubr.f32.mxu0 %v1303_v21  ;;  %1026 = vmatpush3.bf16.msra.mxu0 %v1025_v22  ;;  %v517_v21 = vld [vmem:[#allocation7 + $0xb0] sm:$0xff]  ;;  %v742_v22 = vld [vmem:[%s1416_s5] ss:$0 sm:$0xff]  ;;  %s722_s5 = sshll.u32 %s1184_s4, 4  ;;  %s723_s5 = int_to_ptr.vmem [resolvable:$true] %s722_s5 }
  0x63   :  { %v1027_v24 = vpack.c.bf16 %v518_v23, %v517_v21  ;;  %s1151_s21 = scalar_lea.vmem %s723_s5, 512  ;;  %p1156_p11 = scmp.lt.s32.totalorder %s723_s5, %s723_s5 }
  0x64   :  { %1058 = vmatpush3.bf16.msra.mxu1 %v1055_v6  ;;  %v526_v6 = vld [vmem:[#allocation7 + $0xf8] sm:$0xff]  ;;  %p1152_p10 = scmp.ne.s32.totalorder %s723_s5, %s1151_s21  ;;  %p1157_p12 = scmp.lt.s32.totalorder %s1151_s21, %s1151_s21 }
  0x65   :  { %325 = vmatmul.mubr.f32.gmra.mrb[6].mxu0 %v156_v8  ;;  %1060 = vmatprep.subr.bf16.mxu1 %v1059_v20  ;;  %v1043_v7 = vpack.c.bf16 %v526_v6, %v525_v5  ;;  %v509_v8 = vld [vmem:[#allocation7 + $0x70] sm:$0xff] }
  0x66   :  { %1028 = vmatprep.subr.bf16.mxu0 %v1027_v24  ;;  %v1045_v10 = vpack.c.bf16 %v510_v9, %v509_v8  ;;  %p1158_p13 = por %p1157_p12, %p1156_p11 }
  0x67   :  { %1030 = vmatpush3.bf16.msra.mxu0 %v1029_v31 }
  0x68   :  { %1062 = vmatpush3.bf16.msra.mxu1 %v1059_v20  ;;  %1032 = vmatprep.subr.bf16.mxu0 %v1031_v36  ;;  %p1159_p0 = pnand %p1158_p13, %p1152_p10 }
  0x69   :  { %1064 = vmatprep.subr.bf16.mxu1 %v1063_v29 }
  0x6b   :  { %1034 = vmatpush3.bf16.msra.mxu0 %v1033_v43 }
  0x6c   :  { %1066 = vmatpush3.bf16.msra.mxu1 %v1063_v29  ;;  %1036 = vmatprep.subr.bf16.mxu0 %v1035_v47 }
  0x6d   :  { %1068 = vmatprep.subr.bf16.mxu1 %v1067_v42 }
  0x6f   :  { %1038 = vmatpush3.bf16.msra.mxu0 %v1037_v56 }
  0x70   :  { %1070 = vmatpush3.bf16.msra.mxu1 %v1067_v42  ;;  %1040 = vmatprep.subr.bf16.mxu0 %v1039_v62 }
  0x71   :  { %1072 = vmatprep.subr.bf16.mxu1 %v1071_v55 }
  0x73   :  { %1042 = vmatpush3.bf16.msra.mxu0 %v1041_v4 }
  0x74   :  { %1074 = vmatpush3.bf16.msra.mxu1 %v1071_v55  ;;  %1044 = vmatprep.subr.bf16.mxu0 %v1043_v7 }
  0x75   :  { %1076 = vmatprep.subr.bf16.mxu1 %v1075_v2 }
  0x77   :  { %1046 = vmatpush3.bf16.msra.mxu0 %v1045_v10 }
  0x78   :  { %1078 = vmatpush3.bf16.msra.mxu1 %v1075_v2 }
 0x12c   :  { %v779_v11 = vpop.f32.mrb[0].mxu0 }
 0x12d   :  { %v780_v13 = vpop.f32.mrb[1].mxu0 }
 0x12e   :  { %v909_v14 = vpop.f32.mrb[0].mxu1  ;;  %v781_v15 = vadd.f32 %v780_v13, %v779_v11 }
 0x12f   :  { %v396_v16 = vpop.f32.mrb[1].mxu1 }
 0x130   :  { %v397_v18 = vadd.f32 %v781_v15, %v396_v16  ;;  %v782_v19 = vpop.f32.mrb[2].mxu0 }
 0x131   :  { %v783_v20 = vpop.f32.mrb[3].mxu0 }
 0x132   :  { %v912_v21 = vpop.f32.mrb[2].mxu1  ;;  %v422_v23 = vmul.f32 %v741_v17, %v397_v18  ;;  %v784_v24 = vadd.f32 %v783_v20, %v782_v19 }
 0x133   :  { %v406_v25 = vpop.f32.mrb[3].mxu1 }
 0x134   :  { %v402_v26 = vadd.f32 %v909_v14, %v784_v24  ;;  %v785_v28 = vpop.f32.mrb[4].mxu0  ;;  %v433_v29 = vadd.f32 %v742_v22, %v422_v23 }
 0x135   :  { %v786_v30 = vpop.f32.mrb[5].mxu0 }
 0x136   :  { %v423_v31 = vmul.f32 %v741_v17, %v402_v26  ;;  %v787_v32 = vadd.f32 %v786_v30, %v785_v28  ;;  %v437_v34 = vmax.f32 %v433_v29, 0.0 }
 0x138   :  { %v434_v35 = vadd.f32 %v742_v22, %v423_v31  ;;  %v407_v36 = vadd.f32 %v787_v32, %v406_v25  ;;  %v788_v37 = vpop.f32.mrb[6].mxu0  ;;  %607 = vmatprep.mubr.f32.mxu0 %v437_v34  ;;  %v449_v44 = vrot.slane %v437_v34, 7  ;;  %v474_v45 = vrot.slane %v437_v34, 1 }
 0x139   :  { %v789_v38 = vpop.f32.mrb[7].mxu0 }
 0x13a   :  { %v438_v40 = vmax.f32 %v434_v35, 0.0  ;;  %v424_v42 = vmul.f32 %v741_v17, %v407_v36  ;;  %v790_v43 = vadd.f32 %v789_v38, %v788_v37 }
 0x13c   :  { %v435_v46 = vadd.f32 %v742_v22, %v424_v42  ;;  %v412_v47 = vadd.f32 %v912_v21, %v790_v43  ;;  %v475_v48 = vrot.slane %v438_v40, 1  ;;  %v450_v49 = vrot.slane %v438_v40, 7 }
 0x13e   :  { %v439_v50 = vmax.f32 %v435_v46, 0.0  ;;  %v425_v55 = vmul.f32 %v741_v17, %v412_v47  ;;  %v481_v56 = vsel %vm478_vm6, %v474_v45, %v475_v48  ;;  %v456_v57 = vsel %vm453_vm7, %v449_v44, %v450_v49 }
 0x13f   :  { %945 = vmatprep.mubr.f32.mxu1 %v481_v56 }
 0x140   :  { %v476_v60 = vrot.slane %v439_v50, 1  ;;  %v436_v61 = vadd.f32 %v742_v22, %v425_v55  ;;  %v451_v62 = vrot.slane %v439_v50, 7 }
 0x142   :  { %v440_v63 = vmax.f32 %v436_v61, 0.0  ;;  %v480_v0 = vsel %vm478_vm6, %v475_v48, %v476_v60  ;;  %v455_v1 = vsel %vm453_vm7, %v450_v49, %v451_v62 }
 0x143   :  { %946 = vmatmul.mubr.msk.f32.vlgmr.msra.gmra.mrb[4].mxu1 %vm471_vm8, %v480_v0 }
 0x144   :  { %v452_v2 = vrot.slane %v440_v63, 7  ;;  %v477_v4 = vrot.slane %v440_v63, 1 }
 0x146   :  { %v457_v27 = vsel %vm453_vm7, %v452_v2, %v449_v44  ;;  %v479_v39 = vsel %vm478_vm6, %v476_v60, %v477_v4  ;;  %v482_v5 = vsel %vm478_vm6, %v477_v4, %v474_v45  ;;  %v454_v6 = vsel %vm453_vm7, %v451_v62, %v452_v2 }
 0x147   :  { %743 = vmatmul.mubr.msk.f32.vlgmr.msra.gmra.mrb[8].mxu0 %vm445_vm9, %v457_v27  ;;  %948 = vmatprep.mubr.f32.mxu1 %v479_v39 }
 0x148   :  { %612 = vmatprep.mubr.f32.mxu0 %v438_v40  ;;  %949 = vmatmul.mubr.msk.f32.gmra.mrb[6].mxu1 %vm473_vm10, %v482_v5 }
 0x14b   :  { %613 = vmatmul.mubr.f32.gmra.mrb[10].mxu0 %v456_v57 }
 0x14c   :  { %617 = vmatprep.mubr.f32.mxu0 %v439_v50 }
 0x14f   :  { %744 = vmatmul.mubr.msk.f32.gmra.mrb[12].mxu0 %vm447_vm11, %v455_v1 }
 0x150   :  { %622 = vmatprep.mubr.f32.mxu0 %v440_v63 }
 0x153   :  { %623 = vmatmul.mubr.f32.gmra.mrb[14].mxu0 %v454_v6 }
 0x216   :  { %v947_v33 = vpop.f32.mrb[4].mxu1 }
 0x217   :  { %v694_v41 = vpop.f32.mrb[5].mxu1 }
 0x21a   :  { %v843_v58 = vpop.f32.mrb[8].mxu0 }
 0x21b   :  { %v844_v7 = vpop.f32.mrb[9].mxu0  ;;  %v950_v8 = vpop.f32.mrb[6].mxu1 }
 0x21c   :  { %v845_v9 = vadd.f32 %v844_v7, %v843_v58  ;;  %v704_v12 = vpop.f32.mrb[7].mxu1 }
 0x21e   :  { %v610_v10 = vadd.f32 %v845_v9, %v1277_v51  ;;  %v846_v11 = vpop.f32.mrb[10].mxu0 }
 0x21f   :  { %v847_v13 = vpop.f32.mrb[11].mxu0 }
 0x220   :  { %v695_v14 = vadd.f32 %v694_v41, %v610_v10  ;;  %v848_v15 = vadd.f32 %v847_v13, %v846_v11 }
 0x222   :  { %713 = vst [vmem:[#allocation8] sm:$0xff] %v695_v14  ;;  %v615_v54 = vadd.f32 %v848_v15, %v1289_v59  ;;  %v849_v3 = vpop.f32.mrb[12].mxu0 }
 0x223   :  { %v850_v16 = vpop.f32.mrb[13].mxu0 }
 0x224   :  { %v700_v17 = vadd.f32 %v947_v33, %v615_v54  ;;  %v851_v18 = vadd.f32 %v850_v16, %v849_v3 }
 0x226   :  { %714 = vst [vmem:[#allocation8 + $0x8] sm:$0xff] %v700_v17  ;;  %v620_v19 = vadd.f32 %v851_v18, %v1279_v52  ;;  %v852_v20 = vpop.f32.mrb[14].mxu0 }
 0x227   :  { %v853_v22 = vpop.f32.mrb[15].mxu0 }
 0x228   :  { %v705_v21 = vadd.f32 %v704_v12, %v620_v19  ;;  %v854_v23 = vadd.f32 %v853_v22, %v852_v20 }
 0x22a   :  { %715 = vst [vmem:[#allocation8 + $0x10] sm:$0xff] %v705_v21  ;;  %v625_v51 = vadd.f32 %v854_v23, %v1281_v53 }
 0x22c   :  { %v710_v24 = vadd.f32 %v950_v8, %v625_v51 }
 0x22e   :  { %716 = vst [vmem:[#allocation8 + $0x18] sm:$0xff] %v710_v24 }
 0x22f   :  { %1162 = shalt.err (!%p1159_p0)
}
 0x230   :  { %s1163_s24 = scalar_lea.hbm %s1418_s7, 512 }
 0x231   :  { %p1164_p1 = scmp.ne.s32.totalorder %s1418_s7, %s1163_s24  ;;  %p1167_p2 = scmp.lt.u32.totalorder %s1163_s24, %s1418_s7 }
 0x233   :  { %p1169_p3 = pnand %p1167_p2, %p1164_p1 }
 0x235   :  { %1172 = shalt.err (!%p1169_p3)
}
 0x236   :  { %728 = dma.vmem_to_hbm [thread:$0]  %s723_s5, 512, %s1418_s7, [#allocation4], %s1181_s13, %s1181_s13, %s1182_s14  }
 0x237   :  { %1177 = dma.done.wait [#allocation4], 512  }
 0x238   :  { %1178 = vsyncadd [#allocation4], 4294966784 }
 0x239   :  { %732 = vsyncpa [#allocation3], 1 }
 0x23a   :  { %733 = vsyncpa [#allocation6], 1 }
 0x23b   :  { %734 = vsyncpa [#allocation4], 1 }

</bundles_post_ra>
